<compile_context>
chip_gen: v5e
topology: v5e:2x2
jax: 0.10.0
libtpu: 0.0.40
codegen_flags: <defaults>
</compile_context>

<pallas_src>
import numpy as np
import jax
import jax.numpy as jnp
from jax.experimental import pallas as pl
from jax.experimental.pallas import tpu as pltpu

# Hyperparameters from LogMelSpec.__init__ (torchaudio MelSpectrogram defaults for the
# rest: n_fft=400, power=2.0, center=True, pad_mode="reflect", periodic Hann window,
# HTK mel scale, norm=None, f_min=0, f_max=sr/2).
SAMPLE_RATE = 8000
N_MELS = 128
WIN_LENGTH = 160
HOP_LENGTH = 80
N_FFT = 400
N_FREQ = N_FFT // 2 + 1                # 201 onesided rfft bins
N_FREQ_PAD = 256                       # lane-aligned padding of the freq axis
WIN_OFFSET = (N_FFT - WIN_LENGTH) // 2 # 120: first frame sample with a nonzero window
K_PAD = 256                            # live window (160) zero-padded to a clean K
LOG_EPS = 1e-14                        # np.log(t + 1e-14)
NORM_EPS = 1e-12                       # torch F.normalize default eps
TM_MAX = 1024                          # max frames per tile (few MiB of VMEM per step)


def _round_up(x, m):
    return (x + m - 1) // m * m


def _stacked_windowed_dft():
    """(K_PAD, 2*N_FREQ_PAD) bf16 constant: [win*cos | win*sin] for the 160 live DFT rows.

    Rows m correspond to DFT sample index n = m + WIN_OFFSET (the Hann window, centered
    inside n_fft, is zero everywhere else); rows >= 160 and freq bins >= 201 are zero.
    """
    n = np.arange(WIN_LENGTH, dtype=np.float64)
    win = 0.5 - 0.5 * np.cos(2.0 * np.pi * n / WIN_LENGTH)      # periodic Hann(160)

    nn = (np.arange(WIN_LENGTH, dtype=np.float64) + WIN_OFFSET)[:, None]
    kk = np.arange(N_FREQ, dtype=np.float64)[None, :]
    ang = 2.0 * np.pi * nn * kk / N_FFT
    cos_w = win[:, None] * np.cos(ang)   # window folded into the DFT matrix
    sin_w = win[:, None] * np.sin(ang)   # sign of Im is irrelevant (it gets squared)

    stacked = np.zeros((K_PAD, 2 * N_FREQ_PAD), dtype=np.float32)
    stacked[:WIN_LENGTH, :N_FREQ] = cos_w
    stacked[:WIN_LENGTH, N_FREQ_PAD:N_FREQ_PAD + N_FREQ] = sin_w
    return jnp.asarray(stacked, dtype=jnp.bfloat16)


def _mel_filterbank_padded():
    """(N_FREQ_PAD, n_mels) bf16; torchaudio melscale_fbanks (HTK, norm=None); rows >=201 zero."""
    f_min, f_max = 0.0, SAMPLE_RATE / 2.0
    all_freqs = np.linspace(0.0, SAMPLE_RATE / 2.0, N_FREQ)

    def hz_to_mel(f):
        return 2595.0 * np.log10(1.0 + f / 700.0)

    def mel_to_hz(m):
        return 700.0 * (10.0 ** (m / 2595.0) - 1.0)

    m_pts = np.linspace(hz_to_mel(f_min), hz_to_mel(f_max), N_MELS + 2)
    f_pts = mel_to_hz(m_pts)
    f_diff = f_pts[1:] - f_pts[:-1]
    slopes = f_pts[None, :] - all_freqs[:, None]           # (n_freq, n_mels+2)
    down = -slopes[:, :-2] / f_diff[:-1]
    up = slopes[:, 2:] / f_diff[1:]
    fb = np.clip(np.minimum(down, up), 0.0, None)          # (n_freq, n_mels)

    fb_pad = np.zeros((N_FREQ_PAD, N_MELS), dtype=np.float32)
    fb_pad[:N_FREQ, :] = fb
    return jnp.asarray(fb_pad, dtype=jnp.bfloat16)


def _make_logmel_kernel(tm, n_frames):
    """Frames tile -> transposed log-mel tile + masked per-tile sum-of-squares partial."""

    def kernel(frames_ref, dft_ref, fb_ref, logmel_t_ref, ssq_ref):
        # frames_ref:   (tm, K_PAD)        bf16   (live window samples, zero-padded)
        # dft_ref:      (K_PAD, 2*256)     bf16   (window pre-folded)
        # fb_ref:       (N_FREQ_PAD, 128)  bf16
        # logmel_t_ref: (N_MELS, tm)       f32    (already transposed to output layout)
        # ssq_ref:      (8, N_MELS)        f32
        stft = jnp.dot(frames_ref[...], dft_ref[...],
                       preferred_element_type=jnp.float32)          # (tm, 512) one MXU pass
        re = stft[:, :N_FREQ_PAD]
        im = stft[:, N_FREQ_PAD:]
        power = re * re + im * im                                   # |STFT|^2  (power=2.0)
        mel = jnp.dot(power, fb_ref[...].astype(jnp.float32),
                      preferred_element_type=jnp.float32)           # (tm, n_mels)
        logmel = jnp.log(mel + LOG_EPS)                             # np.log(t + 1e-14)

        # Fused transpose to the (n_mels, frames) PyTorch layout (XLU slot is idle here).
        logmel_t_ref[...] = jnp.transpose(logmel)

        # Partial sum-of-squares over VALID frames only (padded rows masked out); the
        # global per-mel-bin L2 norm is finished outside across tiles.
        row = (pl.program_id(0) * tm
               + jax.lax.broadcasted_iota(jnp.int32, (tm, 1), 0))
        sq = jnp.where(row < n_frames, logmel * logmel, 0.0)
        ssq = jnp.sum(sq, axis=0, keepdims=True)                    # (1, n_mels)
        ssq_ref[...] = jnp.broadcast_to(ssq, (8, N_MELS))

    return kernel


@jax.jit
def log_mel_spec(t):
    """t: (1, T) float32 waveform -> (1, n_mels, n_frames), matching the PyTorch module."""
    wav = t[0].astype(jnp.float32)
    pad = N_FFT // 2
    padded = jnp.pad(wav, (pad, pad), mode="reflect")        # center=True, reflect
    n_frames = (padded.shape[0] - N_FFT) // HOP_LENGTH + 1

    # Gather-free framing of the LIVE window only: frame i needs
    # padded[i*HOP + 120 : i*HOP + 280] (the window is zero outside).  Shift by 40 so
    # each frame's live window is exactly 2 consecutive HOP-sized chunks.
    phase = WIN_OFFSET % HOP_LENGTH               # 40
    base = WIN_OFFSET // HOP_LENGTH               # 1
    segs = WIN_LENGTH // HOP_LENGTH               # 2 (exact: 160 = 2*80)
    n_chunks = n_frames + base + segs - 1
    chunks = padded[phase:phase + n_chunks * HOP_LENGTH].reshape(n_chunks, HOP_LENGTH)
    frames = jnp.concatenate(
        [chunks[base + j: base + j + n_frames] for j in range(segs)], axis=1)  # (n_frames, 160)

    # Frame-axis tiling: multiples of 128 keep every block (and the fused in-kernel
    # transpose) lane/sublane aligned; clips > 128 frames get >= 2 tiles so the
    # "parallel" grid axis engages both v7x TensorCores.
    if n_frames > 128:
        tm = min(TM_MAX, _round_up((n_frames + 1) // 2, 128))
    else:
        tm = 128
    n_pad = _round_up(n_frames, tm)
    n_tiles = n_pad // tm

    # Pad frames to (n_pad, K_PAD) and carry them in bf16 (default MXU precision
    # truncates to bf16 anyway) -> halves the dominant HBM read.
    frames = jnp.pad(frames, ((0, n_pad - n_frames),
                              (0, K_PAD - WIN_LENGTH))).astype(jnp.bfloat16)

    dft = _stacked_windowed_dft()        # (256, 512) bf16, 160 live rows, window folded
    fb = _mel_filterbank_padded()        # (256, 128) bf16

    cparams = pltpu.CompilerParams(
        dimension_semantics=("parallel",),       # v7x: shard frame tiles over its 2 TCs
        vmem_limit_bytes=32 * 1024 * 1024)       # actual per-step use is a few MiB

    logmel_t, ssq = pl.pallas_call(
        _make_logmel_kernel(tm, n_frames),
        out_shape=(jax.ShapeDtypeStruct((N_MELS, n_pad), jnp.float32),
                   jax.ShapeDtypeStruct((n_tiles * 8, N_MELS), jnp.float32)),
        grid=(n_tiles,),
        in_specs=[pl.BlockSpec((tm, K_PAD), lambda i: (i, 0)),
                  pl.BlockSpec((K_PAD, 2 * N_FREQ_PAD), lambda i: (0, 0)),
                  pl.BlockSpec((N_FREQ_PAD, N_MELS), lambda i: (0, 0))],
        out_specs=(pl.BlockSpec((N_MELS, tm), lambda i: (0, i)),
                   pl.BlockSpec((8, N_MELS), lambda i: (i, 0))),
        compiler_params=cparams,
    )(frames, dft, fb)

    # Finish the per-mel-bin L2 norm across tiles (tiny: (n_tiles, 128)), then apply it
    # as an XLA broadcast-multiply fused with the valid-frames slice (kernel 2 removed).
    sumsq = jnp.sum(ssq.reshape(n_tiles, 8, N_MELS)[:, 0, :], axis=0)      # (n_mels,)
    inv = 1.0 / jnp.maximum(jnp.sqrt(sumsq), NORM_EPS)                     # (n_mels,)
    out = logmel_t[:, :n_frames] * inv[:, None]                            # (n_mels, n_frames)

    # == t[None, :] in PyTorch
    return out[None, :, :]


if __name__ == "__main__":
    key = jax.random.PRNGKey(0)
    T = 800                                   # 0.1 s of 8 kHz audio (small)
    t = jax.random.normal(key, (1, T), dtype=jnp.float32)

    y = log_mel_spec(t)
    jax.block_until_ready(y)

    expected_frames = T // HOP_LENGTH + 1     # 11
    assert y.shape == (1, N_MELS, expected_frames), y.shape
    assert y.dtype == jnp.float32
    assert bool(jnp.all(jnp.isfinite(y)))
    print("KERNEL_OK")
</pallas_src>

<mosaic_0001>
module attributes {stable_mosaic.version = 11 : i64} {
  func.func @kernel(%arg0: i32, %arg1: memref<128x256xbf16, #tpu.memory_space<vmem>>, %arg2: memref<256x512xbf16, #tpu.memory_space<vmem>>, %arg3: memref<256x128xbf16, #tpu.memory_space<vmem>>, %arg4: memref<128x128xf32, #tpu.memory_space<vmem>>, %arg5: memref<8x128xf32, #tpu.memory_space<vmem>>) attributes {dimension_semantics = [#tpu.dimension_semantics<parallel>], iteration_bounds = array<i64: 1>, scalar_prefetch = 0 : i64, scratch_operands = 0 : i64, tpu.core_type = #tpu.core_type<tc>, window_params = [{transform_indices = @transform_0, window_bounds = array<i64: 128, 256>}, {pipeline_mode = #tpu.pipeline_mode<synchronous>, transform_indices = @transform_1, window_bounds = array<i64: 256, 512>}, {pipeline_mode = #tpu.pipeline_mode<synchronous>, transform_indices = @transform_2, window_bounds = array<i64: 256, 128>}, {transform_indices = @transform_3, window_bounds = array<i64: 128, 128>}, {transform_indices = @transform_4, window_bounds = array<i64: 8, 128>}]} {
    %c0 = arith.constant 0 : index
    %c0_0 = arith.constant 0 : index
    %0 = vector.load %arg1[%c0, %c0_0] : memref<128x256xbf16, #tpu.memory_space<vmem>>, vector<128x256xbf16>
    %c0_1 = arith.constant 0 : index
    %c0_2 = arith.constant 0 : index
    %1 = vector.load %arg2[%c0_1, %c0_2] : memref<256x512xbf16, #tpu.memory_space<vmem>>, vector<256x512xbf16>
    %cst = arith.constant dense<0.000000e+00> : vector<128x512xf32>
    %2 = tpu.matmul %0, %1, %cst {dimension_numbers = #tpu.dot_dimension_numbers<[1], [0], [0], [1], [0, 0, 1, 1], [], []>} : vector<128x256xbf16>, vector<256x512xbf16>, vector<128x512xf32> -> vector<128x512xf32>
    %3 = vector.extract_strided_slice %2 {offsets = [0, 0], sizes = [128, 256], strides = [1, 1]} : vector<128x512xf32> to vector<128x256xf32>
    %4 = vector.extract_strided_slice %2 {offsets = [0, 256], sizes = [128, 256], strides = [1, 1]} : vector<128x512xf32> to vector<128x256xf32>
    %5 = arith.mulf %3, %3 : vector<128x256xf32>
    %6 = arith.mulf %4, %4 : vector<128x256xf32>
    %7 = arith.addf %5, %6 : vector<128x256xf32>
    %c0_3 = arith.constant 0 : index
    %c0_4 = arith.constant 0 : index
    %8 = vector.load %arg3[%c0_3, %c0_4] : memref<256x128xbf16, #tpu.memory_space<vmem>>, vector<256x128xbf16>
    %9 = arith.extf %8 : vector<256x128xbf16> to vector<256x128xf32>
    %cst_5 = arith.constant dense<0.000000e+00> : vector<128x128xf32>
    %10 = tpu.matmul %7, %9, %cst_5 {dimension_numbers = #tpu.dot_dimension_numbers<[1], [0], [0], [1], [0, 0, 1, 1], [], []>} : vector<128x256xf32>, vector<256x128xf32>, vector<128x128xf32> -> vector<128x128xf32>
    %cst_6 = arith.constant 9.99999982E-15 : f32
    %11 = vector.broadcast %cst_6 : f32 to vector<128x128xf32>
    %12 = arith.addf %10, %11 : vector<128x128xf32>
    %13 = math.log %12 : vector<128x128xf32>
    %14 = tpu.transpose %13, [1, 0] : vector<128x128xf32> -> vector<128x128xf32>
    %c0_7 = arith.constant 0 : index
    %c0_8 = arith.constant 0 : index
    %15 = vector.load %arg4[%c0_7, %c0_8] : memref<128x128xf32, #tpu.memory_space<vmem>>, vector<128x128xf32>
    tpu.vector_store %arg4[%c0_7, %c0_8], %14 {strides = array<i32>} : memref<128x128xf32, #tpu.memory_space<vmem>>, vector<128x128xf32>,
    %c128_i32 = arith.constant 128 : i32
    %16 = arith.muli %arg0, %c128_i32 : i32
    %17 = tpu.iota {dimensions = array<i32: 0>} : vector<128x1xi32>
    %18 = vector.broadcast %16 : i32 to vector<128x1xi32>
    %19 = arith.addi %18, %17 : vector<128x1xi32>
    %c11_i32 = arith.constant 11 : i32
    %20 = vector.broadcast %c11_i32 : i32 to vector<128x1xi32>
    %21 = arith.cmpi slt, %19, %20 : vector<128x1xi32>
    %22 = arith.mulf %13, %13 : vector<128x128xf32>
    %cst_9 = arith.constant 0.000000e+00 : f32
    %23 = vector.shape_cast %21 : vector<128x1xi1> to vector<128x1xi1>
    %24 = vector.broadcast %23 : vector<128x1xi1> to vector<128x128xi1>
    %25 = vector.broadcast %cst_9 : f32 to vector<128x128xf32>
    %26 = arith.select %24, %22, %25 : vector<128x128xi1>, vector<128x128xf32>
    %cst_10 = arith.constant dense<0.000000e+00> : vector<128xf32>
    %27 = vector.multi_reduction <add>, %26, %cst_10 [0] : vector<128x128xf32> to vector<128xf32>
    %28 = vector.shape_cast %27 : vector<128xf32> to vector<1x128xf32>
    %29 = vector.shape_cast %28 : vector<1x128xf32> to vector<1x128xf32>
    %30 = vector.broadcast %29 : vector<1x128xf32> to vector<8x128xf32>
    %c0_11 = arith.constant 0 : index
    %c0_12 = arith.constant 0 : index
    %31 = vector.load %arg5[%c0_11, %c0_12] : memref<8x128xf32, #tpu.memory_space<vmem>>, vector<8x128xf32>
    tpu.vector_store %arg5[%c0_11, %c0_12], %30 {strides = array<i32>} : memref<8x128xf32, #tpu.memory_space<vmem>>, vector<8x128xf32>,
    return
  }
  func.func @transform_0(%arg0: i32) -> (i32, i32) {
    %c0_i32 = arith.constant 0 : i32
    %c0_i32_0 = arith.constant 0 : i32
    return %arg0, %c0_i32 : i32, i32
  }
  func.func @transform_1(%arg0: i32) -> (i32, i32) {
    %c0_i32 = arith.constant 0 : i32
    %c0_i32_0 = arith.constant 0 : i32
    %c0_i32_1 = arith.constant 0 : i32
    return %c0_i32, %c0_i32_0 : i32, i32
  }
  func.func @transform_2(%arg0: i32) -> (i32, i32) {
    %c0_i32 = arith.constant 0 : i32
    %c0_i32_0 = arith.constant 0 : i32
    %c0_i32_1 = arith.constant 0 : i32
    return %c0_i32, %c0_i32_0 : i32, i32
  }
  func.func @transform_3(%arg0: i32) -> (i32, i32) {
    %c0_i32 = arith.constant 0 : i32
    %c0_i32_0 = arith.constant 0 : i32
    return %c0_i32, %arg0 : i32, i32
  }
  func.func @transform_4(%arg0: i32) -> (i32, i32) {
    %c0_i32 = arith.constant 0 : i32
    %c0_i32_0 = arith.constant 0 : i32
    return %arg0, %c0_i32 : i32, i32
  }
}

</mosaic_0001>

<bundles_post_ra>
// kernel: reverse.1
= control target key start
LH: loop header
LB: loop body
LE: loop exit
PB: predicated region body
PF: predicated region fallthrough
CT: control target
= control target key end

     0   :  { %v2_v0 = vlaneseq  ;;  %s150_s0 = inlined_call_operand.vmem [shape: bf16[256], index: 0, kind: input, shape index: {}]   ;;  %s151_s1 = inlined_call_operand.vmem [shape: bf16[256], index: 1, kind: output, shape index: {}]  }
   0x2   :  { %v3_v1 = vsub.s32 127, %v2_v0 }
   0x4   :  { %4 = vset.pattern.permute.xlu0 %v3_v1 }
   0x5   :  { %v65_v2 = vld [vmem:[#allocation1] sm:$0x1]  ;;  %v22_v3 = vld [vmem:[%s150_s0] sm:$0x1]  ;;  %v82_v12 = vshrl.u32 %v2_v0, 7 }
   0x6   :  { %v66_v4 = vunpack.c.l.bf16 %v65_v2  ;;  %23 = vst [vmem:[#allocation1 + $0x1] sm:$0x1] %v22_v3 }
   0x7   :  { %vm83_vm0 = vcmp.lt.s32.totalorder %v82_v12, 2 }
   0x8   :  { %68 = vst [vmem:[#allocation0] sm:$0x3] %v66_v4 }
   0xd   :  { %v51_v5 = vld [vmem:[#allocation1 + $0x1] sm:$0x1] }
   0xe   :  { %v52_v6 = vunpack.c.l.bf16 %v51_v5 }
   0xf   :  { %v70_v7 = vld [vmem:[#allocation0 + $0x7] ss:$-1 sm:$0xff] }
  0x10   :  { %v71_v8 = vrot.slane %v70_v7, 6  ;;  %55 = vst [vmem:[#allocation0 + $0x8] sm:$0x3] %v52_v6 }
  0x12   :  { %72 = vperm.xlu0 %4, %v71_v8  }
  0x17   :  { %v77_v9 = vld [vmem:[#allocation0 + $0xf] ss:$-1 sm:$0xff] }
  0x18   :  { %v78_v10 = vrot.slane %v77_v9, 6 }
  0x1a   :  { %79 = vperm.xlu0 %4, %v78_v10  }
  0x84   :  { %v73_v11 = vpop.permute.xlu0 %72 }
  0x85   :  { %74 = vst [vmem:[#allocation2] sm:$0xff] %v73_v11 }
  0x8c   :  { %v80_v13 = vpop.permute.xlu0 %79 }
  0x8d   :  { %84 = vst.msk [vmem:[#allocation2] sm:$0xff] %vm83_vm0, %v80_v13 }
  0x94   :  { %v87_v14 = vld [vmem:[#allocation2] sm:$0x3] }
  0x95   :  { %v88_v15 = vpack.c.bf16 0.0, %v87_v14 }
  0x97   :  { %91 = vst [vmem:[#allocation3] sm:$0x1] %v88_v15 }
  0x9e   :  { %v108_v16 = vld [vmem:[#allocation3] sm:$0x1] }
  0x9f   :  { %109 = vst [vmem:[%s151_s1] sm:$0x1] %v108_v16 }

</bundles_post_ra>
